<compile_context>
chip_gen: v5e
topology: v5e:2x2
jax: 0.10.0
libtpu: 0.0.40
codegen_flags: <defaults>
</compile_context>

<pallas_src>
import functools

import jax
import jax.numpy as jnp
from jax.experimental import pallas as pl
from jax.experimental.pallas import tpu as pltpu

_EPS = 1e-6


def _sim(a, b):
    """cosine similarity along the last axis, keepdims -> (rows, 1) float32.

    Products are done in the streamed dtype; accumulation is forced to f32.
    """
    p12 = jnp.sum(a * b, axis=-1, keepdims=True, dtype=jnp.float32)
    p1 = jnp.sqrt(jnp.sum(a * a, axis=-1, keepdims=True, dtype=jnp.float32))
    p2 = jnp.sqrt(jnp.sum(b * b, axis=-1, keepdims=True, dtype=jnp.float32))
    return p12 / (p1 * p2 + jnp.float32(_EPS))


def _row_kernel(x1_ref, x1p_ref, x2_ref, x2p_ref, loss_ref, *, alpha):
    """Per-row losses (reduction='none').  OOB rows of the ragged last tile
    are never stored (Pallas masks the out-of-bounds output write)."""
    loss_ref[...] = jnp.float32(alpha) * (
        _sim(x1_ref[...], x1p_ref[...]) + _sim(x2_ref[...], x2p_ref[...]))


def _tile_sum_kernel(x1_ref, x1p_ref, x2_ref, x2p_ref, part_ref, *,
                     alpha, batch, tile_b):
    """One partial sum per grid step (reduction='mean'/'sum')."""
    s = _sim(x1_ref[...], x1p_ref[...]) + _sim(x2_ref[...], x2p_ref[...])
    # Mask rows past the true batch (ragged last tile; inputs were NOT padded).
    row = (jax.lax.broadcasted_iota(jnp.int32, (tile_b, 1), 0)
           + pl.program_id(0) * tile_b)
    s = jnp.where(row < batch, s, jnp.float32(0.0))
    val = jnp.float32(alpha) * jnp.sum(s)
    # Lane-dense broadcast write; wrapper reads [:, 0, 0].
    part_ref[...] = jnp.zeros(part_ref.shape, jnp.float32) + val


def _vmem_capacity_bytes():
    try:
        return int(pltpu.get_tpu_info().vmem_capacity_bytes)
    except Exception:
        return 64 * 1024 * 1024  # conservative (v7x-sized) fallback


def _choose_tile_b(B, D, itemsize, vmem_capacity, per_row_output):
    """Largest batch tile whose double-buffered footprint fits ~40% of VMEM."""
    pack = 16 if itemsize == 2 else 8          # sublane packing (bf16 vs f32)
    d_pad = -(-D // 128) * 128                 # lane padding of the feature dim
    per_row = 4 * 2 * d_pad * itemsize         # 4 streams x 2 pipeline buffers
    per_row += 2 * d_pad * 4                   # headroom for f32 intermediates
    if per_row_output:
        per_row += 2 * 128 * 4                 # (tile_b,1) block lane-pads to 128
    budget = int(vmem_capacity * 0.40)
    tile = max(pack, (budget // per_row) // pack * pack)
    # >= 2 grid steps for large-enough problems so v7x's 2 TCs both get work.
    if B >= 128:
        half = -(-B // 2)
        half = -(-half // pack) * pack
        tile = min(tile, half)
    tile = min(tile, -(-B // pack) * pack)     # never exceed (padded) B
    return max(pack, tile), budget


def consistency_loss(x1, x1_projection, x2, x2_projection,
                     alpha=-0.5, reduction="mean", tile_b=None):
    """Pallas implementation of ConsistencyLoss(alpha, reduction)."""
    assert x1.shape == x1_projection.shape == x2.shape == x2_projection.shape
    assert x1.ndim >= 2, "expected (..., features) inputs"
    lead_shape = x1.shape[:-1]
    D = x1.shape[-1]
    x1 = x1.reshape(-1, D)
    x1p = x1_projection.reshape(-1, D)
    x2 = x2.reshape(-1, D)
    x2p = x2_projection.reshape(-1, D)
    B = x1.shape[0]
    itemsize = jnp.dtype(x1.dtype).itemsize

    vmem_cap = _vmem_capacity_bytes()
    per_row_output = reduction not in ("mean", "sum")
    if tile_b is None:
        tile_b, budget = _choose_tile_b(B, D, itemsize, vmem_cap, per_row_output)
    else:
        budget = int(vmem_cap * 0.40)
    vmem_limit = max(32 << 20, min(int(vmem_cap * 0.75), budget + (24 << 20)))

    num_tiles = -(-B // tile_b)
    grid = (num_tiles,)
    in_spec = pl.BlockSpec((tile_b, D), lambda i: (i, 0))

    cost = pl.CostEstimate(
        flops=12 * B * D,
        transcendentals=4 * B,
        bytes_accessed=4 * B * D * itemsize + 4 * B,
    )
    cparams = pltpu.CompilerParams(
        dimension_semantics=("parallel",),
        vmem_limit_bytes=vmem_limit,
    )

    if per_row_output:
        per_row = pl.pallas_call(
            functools.partial(_row_kernel, alpha=alpha),
            out_shape=jax.ShapeDtypeStruct((B, 1), jnp.float32),
            grid_spec=pltpu.PrefetchScalarGridSpec(
                num_scalar_prefetch=0,
                grid=grid,
                in_specs=[in_spec, in_spec, in_spec, in_spec],
                out_specs=pl.BlockSpec((tile_b, 1), lambda i: (i, 0)),
            ),
            compiler_params=cparams,
            cost_estimate=cost,
        )(x1, x1p, x2, x2p)
        return per_row[:, 0].reshape(lead_shape)

    partials = pl.pallas_call(
        functools.partial(_tile_sum_kernel, alpha=alpha, batch=B, tile_b=tile_b),
        out_shape=jax.ShapeDtypeStruct((num_tiles, 8, 128), jnp.float32),
        grid_spec=pltpu.PrefetchScalarGridSpec(
            num_scalar_prefetch=0,
            grid=grid,
            in_specs=[in_spec, in_spec, in_spec, in_spec],
            out_specs=pl.BlockSpec((1, 8, 128), lambda i: (i, 0, 0)),
        ),
        compiler_params=cparams,
        cost_estimate=cost,
    )(x1, x1p, x2, x2p)

    total = jnp.sum(partials[:, 0, 0])
    if reduction == "mean":
        return total / jnp.float32(B)
    return total  # 'sum'


def _reference(x1, x1p, x2, x2p, alpha=-0.5, reduction="mean"):
    def sim(a, b):
        a = a.astype(jnp.float32)
        b = b.astype(jnp.float32)
        p12 = jnp.sum(a * b, axis=-1)
        p1 = jnp.sqrt(jnp.sum(a * a, axis=-1))
        p2 = jnp.sqrt(jnp.sum(b * b, axis=-1))
        return p12 / (p1 * p2 + 1e-06)

    loss = alpha * (sim(x1, x1p) + sim(x2, x2p))
    if reduction == "mean":
        return jnp.mean(loss)
    elif reduction == "sum":
        return jnp.sum(loss)
    return loss


if __name__ == "__main__":
    key = jax.random.PRNGKey(0)

    def make(key, shape, dtype):
        ks = jax.random.split(key, 5)
        arrs = [jax.random.normal(k, shape, dtype=dtype) for k in ks[:4]]
        return arrs, ks[4]

    # Test 1: small aligned f32 problem, mean reduction.
    (x1, x1p, x2, x2p), key = make(key, (16, 128), jnp.float32)
    out = jax.block_until_ready(consistency_loss(x1, x1p, x2, x2p, alpha=-0.5))
    ref = _reference(x1, x1p, x2, x2p, alpha=-0.5)
    assert jnp.allclose(out, ref, atol=1e-5, rtol=1e-5), (out, ref)

    # Test 2: ragged batch + non-128 feature dim (exercises in-kernel mask), sum.
    (x1, x1p, x2, x2p), key = make(key, (37, 96), jnp.float32)
    out = jax.block_until_ready(
        consistency_loss(x1, x1p, x2, x2p, alpha=-0.5, reduction="sum"))
    ref = _reference(x1, x1p, x2, x2p, alpha=-0.5, reduction="sum")
    assert jnp.allclose(out, ref, atol=1e-4, rtol=1e-4), (out, ref)

    # Test 3: bf16 inputs (streamed as bf16, bf16 products, f32 accumulation).
    (x1, x1p, x2, x2p), key = make(key, (48, 128), jnp.bfloat16)
    out = jax.block_until_ready(consistency_loss(x1, x1p, x2, x2p, alpha=-0.5))
    ref = _reference(x1, x1p, x2, x2p, alpha=-0.5)
    assert jnp.allclose(out, ref, atol=2e-3, rtol=2e-2), (out, ref)

    # Test 4: reduction='none' per-row path, ragged batch (OOB store masking).
    (x1, x1p, x2, x2p), key = make(key, (19, 64), jnp.float32)
    out = jax.block_until_ready(
        consistency_loss(x1, x1p, x2, x2p, alpha=-0.5, reduction="none"))
    ref = _reference(x1, x1p, x2, x2p, alpha=-0.5, reduction="none")
    assert out.shape == ref.shape
    assert jnp.allclose(out, ref, atol=1e-5, rtol=1e-5), (out, ref)

    # Test 5: >= 2 grid steps with a ragged last tile, mean reduction.
    (x1, x1p, x2, x2p), key = make(key, (300, 128), jnp.float32)
    out = jax.block_until_ready(consistency_loss(x1, x1p, x2, x2p, alpha=-0.5))
    ref = _reference(x1, x1p, x2, x2p, alpha=-0.5)
    assert jnp.allclose(out, ref, atol=1e-5, rtol=1e-5), (out, ref)

    # Test 6: leading dims are flattened like torch (B1, B2, D) inputs.
    (x1, x1p, x2, x2p), key = make(key, (2, 7, 32), jnp.float32)
    out = jax.block_until_ready(consistency_loss(x1, x1p, x2, x2p, alpha=-0.5))
    ref = _reference(x1, x1p, x2, x2p, alpha=-0.5)
    assert jnp.allclose(out, ref, atol=1e-5, rtol=1e-5), (out, ref)

    print("KERNEL_OK")
</pallas_src>

<mosaic_0001>
module attributes {stable_mosaic.version = 11 : i64} {
  func.func @_tile_sum_kernel(%arg0: i32, %arg1: memref<16x128xf32, #tpu.memory_space<vmem>>, %arg2: memref<16x128xf32, #tpu.memory_space<vmem>>, %arg3: memref<16x128xf32, #tpu.memory_space<vmem>>, %arg4: memref<16x128xf32, #tpu.memory_space<vmem>>, %arg5: memref<1x8x128xf32, #tpu.memory_space<vmem>>) attributes {dimension_semantics = [#tpu.dimension_semantics<parallel>], iteration_bounds = array<i64: 1>, scalar_prefetch = 0 : i64, scratch_operands = 0 : i64, tpu.core_type = #tpu.core_type<tc>, window_params = [{transform_indices = @transform_0, window_bounds = array<i64: 16, 128>}, {transform_indices = @transform_1, window_bounds = array<i64: 16, 128>}, {transform_indices = @transform_2, window_bounds = array<i64: 16, 128>}, {transform_indices = @transform_3, window_bounds = array<i64: 16, 128>}, {transform_indices = @transform_4, window_bounds = array<i64: 1, 8, 128>}]} {
    %c0 = arith.constant 0 : index
    %c0_0 = arith.constant 0 : index
    %0 = vector.load %arg1[%c0, %c0_0] : memref<16x128xf32, #tpu.memory_space<vmem>>, vector<16x128xf32>
    %c0_1 = arith.constant 0 : index
    %c0_2 = arith.constant 0 : index
    %1 = vector.load %arg2[%c0_1, %c0_2] : memref<16x128xf32, #tpu.memory_space<vmem>>, vector<16x128xf32>
    %2 = arith.mulf %0, %1 : vector<16x128xf32>
    %cst = arith.constant dense<0.000000e+00> : vector<16xf32>
    %3 = vector.multi_reduction <add>, %2, %cst [1] : vector<16x128xf32> to vector<16xf32>
    %4 = vector.shape_cast %3 : vector<16xf32> to vector<16x1xf32>
    %5 = arith.mulf %0, %0 : vector<16x128xf32>
    %cst_3 = arith.constant dense<0.000000e+00> : vector<16xf32>
    %6 = vector.multi_reduction <add>, %5, %cst_3 [1] : vector<16x128xf32> to vector<16xf32>
    %7 = vector.shape_cast %6 : vector<16xf32> to vector<16x1xf32>
    %8 = math.sqrt %7 : vector<16x1xf32>
    %9 = arith.mulf %1, %1 : vector<16x128xf32>
    %cst_4 = arith.constant dense<0.000000e+00> : vector<16xf32>
    %10 = vector.multi_reduction <add>, %9, %cst_4 [1] : vector<16x128xf32> to vector<16xf32>
    %11 = vector.shape_cast %10 : vector<16xf32> to vector<16x1xf32>
    %12 = math.sqrt %11 : vector<16x1xf32>
    %13 = arith.mulf %8, %12 : vector<16x1xf32>
    %cst_5 = arith.constant 9.99999997E-7 : f32
    %14 = vector.broadcast %cst_5 : f32 to vector<16x1xf32>
    %15 = arith.addf %13, %14 : vector<16x1xf32>
    %16 = arith.divf %4, %15 : vector<16x1xf32>
    %c0_6 = arith.constant 0 : index
    %c0_7 = arith.constant 0 : index
    %17 = vector.load %arg3[%c0_6, %c0_7] : memref<16x128xf32, #tpu.memory_space<vmem>>, vector<16x128xf32>
    %c0_8 = arith.constant 0 : index
    %c0_9 = arith.constant 0 : index
    %18 = vector.load %arg4[%c0_8, %c0_9] : memref<16x128xf32, #tpu.memory_space<vmem>>, vector<16x128xf32>
    %19 = arith.mulf %17, %18 : vector<16x128xf32>
    %cst_10 = arith.constant dense<0.000000e+00> : vector<16xf32>
    %20 = vector.multi_reduction <add>, %19, %cst_10 [1] : vector<16x128xf32> to vector<16xf32>
    %21 = vector.shape_cast %20 : vector<16xf32> to vector<16x1xf32>
    %22 = arith.mulf %17, %17 : vector<16x128xf32>
    %cst_11 = arith.constant dense<0.000000e+00> : vector<16xf32>
    %23 = vector.multi_reduction <add>, %22, %cst_11 [1] : vector<16x128xf32> to vector<16xf32>
    %24 = vector.shape_cast %23 : vector<16xf32> to vector<16x1xf32>
    %25 = math.sqrt %24 : vector<16x1xf32>
    %26 = arith.mulf %18, %18 : vector<16x128xf32>
    %cst_12 = arith.constant dense<0.000000e+00> : vector<16xf32>
    %27 = vector.multi_reduction <add>, %26, %cst_12 [1] : vector<16x128xf32> to vector<16xf32>
    %28 = vector.shape_cast %27 : vector<16xf32> to vector<16x1xf32>
    %29 = math.sqrt %28 : vector<16x1xf32>
    %30 = arith.mulf %25, %29 : vector<16x1xf32>
    %cst_13 = arith.constant 9.99999997E-7 : f32
    %31 = vector.broadcast %cst_13 : f32 to vector<16x1xf32>
    %32 = arith.addf %30, %31 : vector<16x1xf32>
    %33 = arith.divf %21, %32 : vector<16x1xf32>
    %34 = arith.addf %16, %33 : vector<16x1xf32>
    %35 = tpu.iota {dimensions = array<i32: 0>} : vector<16x1xi32>
    %c16_i32 = arith.constant 16 : i32
    %36 = arith.muli %arg0, %c16_i32 : i32
    %37 = vector.broadcast %36 : i32 to vector<16x1xi32>
    %38 = arith.addi %35, %37 : vector<16x1xi32>
    %c16_i32_14 = arith.constant 16 : i32
    %39 = vector.broadcast %c16_i32_14 : i32 to vector<16x1xi32>
    %40 = arith.cmpi slt, %38, %39 : vector<16x1xi32>
    %cst_15 = arith.constant 0.000000e+00 : f32
    %41 = vector.broadcast %cst_15 : f32 to vector<16x1xf32>
    %42 = arith.select %40, %34, %41 : vector<16x1xi1>, vector<16x1xf32>
    %43 = vector.shape_cast %42 : vector<16x1xf32> to vector<1x16x1xf32>
    %cst_16 = arith.constant dense<0.000000e+00> : vector<1xf32>
    %44 = vector.multi_reduction <add>, %43, %cst_16 [1, 2] : vector<1x16x1xf32> to vector<1xf32>
    %45 = vector.shape_cast %44 : vector<1xf32> to vector<1x1x1xf32>
    %46 = vector.extract %45[0, 0, 0] : f32 from vector<1x1x1xf32>
    %cst_17 = arith.constant -5.000000e-01 : f32
    %47 = arith.mulf %cst_17, %46 : f32
    %cst_18 = arith.constant 0.000000e+00 : f32
    %48 = vector.broadcast %cst_18 : f32 to vector<1x8x128xf32>
    %49 = vector.broadcast %47 : f32 to vector<1x8x128xf32>
    %50 = arith.addf %48, %49 : vector<1x8x128xf32>
    %c0_19 = arith.constant 0 : index
    %c0_20 = arith.constant 0 : index
    %c0_21 = arith.constant 0 : index
    %51 = vector.load %arg5[%c0_19, %c0_20, %c0_21] : memref<1x8x128xf32, #tpu.memory_space<vmem>>, vector<1x8x128xf32>
    tpu.vector_store %arg5[%c0_19, %c0_20, %c0_21], %50 {strides = array<i32>} : memref<1x8x128xf32, #tpu.memory_space<vmem>>, vector<1x8x128xf32>,
    return
  }
  func.func @transform_0(%arg0: i32) -> (i32, i32) {
    %c0_i32 = arith.constant 0 : i32
    %c0_i32_0 = arith.constant 0 : i32
    return %arg0, %c0_i32 : i32, i32
  }
  func.func @transform_1(%arg0: i32) -> (i32, i32) {
    %c0_i32 = arith.constant 0 : i32
    %c0_i32_0 = arith.constant 0 : i32
    return %arg0, %c0_i32 : i32, i32
  }
  func.func @transform_2(%arg0: i32) -> (i32, i32) {
    %c0_i32 = arith.constant 0 : i32
    %c0_i32_0 = arith.constant 0 : i32
    return %arg0, %c0_i32 : i32, i32
  }
  func.func @transform_3(%arg0: i32) -> (i32, i32) {
    %c0_i32 = arith.constant 0 : i32
    %c0_i32_0 = arith.constant 0 : i32
    return %arg0, %c0_i32 : i32, i32
  }
  func.func @transform_4(%arg0: i32) -> (i32, i32, i32) {
    %c0_i32 = arith.constant 0 : i32
    %c0_i32_0 = arith.constant 0 : i32
    %c0_i32_1 = arith.constant 0 : i32
    return %arg0, %c0_i32, %c0_i32_0 : i32, i32, i32
  }
}

</mosaic_0001>

<bundles_post_ra>
// kernel: tpu_custom_call.1
= control target key start
LH: loop header
LB: loop body
LE: loop exit
PB: predicated region body
PF: predicated region fallthrough
CT: control target
= control target key end

     0   :  { %9 = vsyncpa [#allocation3], 0  ;;  %s636_s0 = inlined_call_operand.hbm [shape: f32[16,128], index: 0, kind: input, shape index: {}]   ;;  %s637_s1 = inlined_call_operand.hbm [shape: f32[16,128], index: 1, kind: input, shape index: {}]   ;;  %s638_s2 = inlined_call_operand.hbm [shape: f32[16,128], index: 2, kind: input, shape index: {}]   ;;  %s639_s3 = inlined_call_operand.hbm [shape: f32[16,128], index: 3, kind: input, shape index: {}]   ;;  %s640_s4 = inlined_call_operand.hbm [shape: f32[1,8,128], index: 4, kind: output, shape index: {}]  }
   0x1   :  { %10 = vsyncpa [#allocation6], 0 }
   0x2   :  { %11 = vsyncpa [#allocation9], 0 }
   0x3   :  { %12 = vsyncpa [#allocation4], 0  ;;  %s30_s17 = sshll.u32 %s637_s1, 4  ;;  %s499_s18 = smov [#allocation5]   ;;  %s31_s17 = int_to_ptr.hbm [resolvable:$true] %s30_s17 }
   0x4   :  { %s32_s19 = sshll.u32 %s499_s18, 4  ;;  %s17_s22 = sshll.u32 %s636_s0, 4  ;;  %s33_s19 = int_to_ptr.vmem [resolvable:$true] %s32_s19  ;;  %s18_s22 = int_to_ptr.hbm [resolvable:$true] %s17_s22 }
   0x5   :  { %s500_s23 = smov 128   ;;  %s501_s24 = smov 8  }
   0x6   :  { %38 = dma.hbm_to_vmem [thread:$0]  %s31_s17, 256, %s33_s19, [#allocation6], %s500_s23, %s500_s23, %s501_s24  }
   0x7   :  { %s502_s25 = smov [#allocation2]   ;;  %s43_s29 = sshll.u32 %s638_s2, 4  ;;  %s44_s29 = int_to_ptr.hbm [resolvable:$true] %s43_s29 }
   0x8   :  { %s19_s26 = sshll.u32 %s502_s25, 4  ;;  %s56_s5 = sshll.u32 %s639_s3, 4  ;;  %s20_s26 = int_to_ptr.vmem [resolvable:$true] %s19_s26  ;;  %s57_s5 = int_to_ptr.hbm [resolvable:$true] %s56_s5 }
   0x9   :  { %25 = dma.hbm_to_vmem [thread:$0]  %s18_s22, 256, %s20_s26, [#allocation3], %s500_s23, %s500_s23, %s501_s24  }
   0xa   :  { %s503_s6 = smov [#allocation7]   ;;  %s504_s0 = smov [#allocation8]  }
   0xb   :  { %s45_s7 = sshll.u32 %s503_s6, 4  ;;  %s58_s8 = sshll.u32 %s504_s0, 4  ;;  %s46_s7 = int_to_ptr.vmem [resolvable:$true] %s45_s7  ;;  %s59_s8 = int_to_ptr.vmem [resolvable:$true] %s58_s8 }
   0xc   :  { %51 = dma.hbm_to_vmem [thread:$0]  %s44_s29, 256, %s46_s7, [#allocation6], %s500_s23, %s500_s23, %s501_s24  }
   0xd   :  { %64 = dma.hbm_to_vmem [thread:$0]  %s57_s5, 256, %s59_s8, [#allocation9], %s500_s23, %s500_s23, %s501_s24  }
   0xe   :  { %491 = dma.done.wait [#allocation3], 256  }
   0xf   :  { %492 = vsyncadd [#allocation3], 4294967040 }
  0x10   :  { %493 = dma.done.wait [#allocation6], 512  }
  0x11   :  { %494 = vsyncadd [#allocation6], 4294966784 }
  0x12   :  { %495 = dma.done.wait [#allocation9], 256  }
  0x13   :  { %496 = vsyncadd [#allocation9], 4294967040  ;;  %v185_v0 = vld [vmem:[#allocation7] sm:$0xff]  ;;  %v83_v1 = vld [vmem:[#allocation5] sm:$0xff]  ;;  %s505_s2 = smov [#allocation10]   ;;  %s326_s11 = sshll.u32 %s640_s4, 4  ;;  %s327_s11 = int_to_ptr.hbm [resolvable:$true] %s326_s11 }
  0x14   :  { %v81_v2 = vld [vmem:[#allocation2] sm:$0xff]  ;;  %v195_v3 = vmul.f32 %v185_v0, %v185_v0  ;;  %v121_v4 = vmul.f32 %v83_v1, %v83_v1  ;;  %v186_v6 = vld [vmem:[#allocation7 + $0x8] sm:$0xff]  ;;  %v84_v7 = vld [vmem:[#allocation5 + $0x8] sm:$0xff]  ;;  %s324_s3 = sshll.u32 %s505_s2, 4  ;;  %s325_s3 = int_to_ptr.vmem [resolvable:$true] %s324_s3 }
  0x15   :  { %v91_v5 = vmul.f32 %v81_v2, %v81_v2  ;;  %v82_v8 = vld [vmem:[#allocation2 + $0x8] sm:$0xff]  ;;  %v196_v9 = vmul.f32 %v186_v6, %v186_v6  ;;  %v122_v10 = vmul.f32 %v84_v7, %v84_v7  ;;  %v188_v12 = vld [vmem:[#allocation8 + $0x8] sm:$0xff]  ;;  %v187_v13 = vld [vmem:[#allocation8] sm:$0xff]  ;;  %v85_v15 = vmul.f32 %v83_v1, %v81_v2 }
  0x16   :  { %197 = vadd.xlane.f32.xlu2 %v195_v3  ;;  %123 = vadd.xlane.f32.xlu1 %v121_v4  ;;  %v92_v11 = vmul.f32 %v82_v8, %v82_v8  ;;  %v226_v14 = vmul.f32 %v188_v12, %v188_v12  ;;  %v225_v16 = vmul.f32 %v187_v13, %v187_v13 }
  0x17   :  { %93 = vadd.xlane.f32.xlu0 %v91_v5  ;;  %v189_v17 = vmul.f32 %v187_v13, %v185_v0  ;;  %v190_v18 = vmul.f32 %v188_v12, %v186_v6  ;;  %v86_v19 = vmul.f32 %v84_v7, %v82_v8 }
  0x1e   :  { %199 = vadd.xlane.f32.xlu2 %v196_v9  ;;  %125 = vadd.xlane.f32.xlu1 %v122_v10 }
  0x1f   :  { %95 = vadd.xlane.f32.xlu0 %v92_v11 }
  0x26   :  { %229 = vadd.xlane.f32.xlu1 %v226_v14  ;;  %87 = vadd.xlane.f32.xlu2 %v85_v15 }
  0x27   :  { %227 = vadd.xlane.f32.xlu0 %v225_v16 }
  0x2e   :  { %191 = vadd.xlane.f32.xlu1 %v189_v17  ;;  %193 = vadd.xlane.f32.xlu2 %v190_v18 }
  0x2f   :  { %89 = vadd.xlane.f32.xlu0 %v86_v19 }
  0x89   :  { %v543_v20 = vpop.xlane.xlu2 %197  ;;  %v124_v21 = vpop.xlane.xlu1 %123 }
  0x8a   :  { %347 = vrsqrt.f32 %v543_v20  ;;  %v94_v22 = vpop.xlane.xlu0 %93  ;;  %vm134_vm0 = vcmp.eq.f32.partialorder %v124_v21, inf  ;;  %vm136_vm1 = vcmp.eq.f32.partialorder %v124_v21, 0.0  ;;  %v137_v47 = vand.u32 2147483648, %v124_v21 }
  0x8b   :  { %349 = vrsqrt.f32 %v124_v21  ;;  %vm104_vm2 = vcmp.eq.f32.partialorder %v94_v22, inf  ;;  %v107_v57 = vand.u32 2147483648, %v94_v22  ;;  %vm106_vm3 = vcmp.eq.f32.partialorder %v94_v22, 0.0 }
  0x8c   :  { %351 = vrsqrt.f32 %v94_v22  ;;  %vm208_vm9 = vcmp.eq.f32.partialorder %v543_v20, inf  ;;  %vm210_vm14 = vcmp.eq.f32.partialorder %v543_v20, 0.0 }
  0x90   :  { %v546_v23 = vpop.eup %347 }
  0x91   :  { %v350_v24 = vpop.eup %349  ;;  %v548_v25 = vpop.xlane.xlu2 %199  ;;  %v202_v32 = vmul.f32 %v546_v23, %v543_v20 }
  0x92   :  { %v550_v26 = vpop.xlane.xlu1 %125  ;;  %v352_v27 = vpop.eup %351  ;;  %v128_v28 = vmul.f32 %v350_v24, %v124_v21  ;;  %353 = vrsqrt.f32 %v548_v25  ;;  %vm220_vm8 = vcmp.eq.f32.partialorder %v548_v25, inf  ;;  %vm222_vm11 = vcmp.eq.f32.partialorder %v548_v25, 0.0 }
  0x93   :  { %v553_v29 = vpop.xlane.xlu0 %95  ;;  %v98_v30 = vmul.f32 %v352_v27, %v94_v22  ;;  %355 = vrsqrt.f32 %v550_v26  ;;  %v203_v39 = vmul.f32 %v546_v23, %v202_v32  ;;  %vm146_vm4 = vcmp.eq.f32.partialorder %v550_v26, inf }
  0x94   :  { %v129_v31 = vmul.f32 %v350_v24, %v128_v28  ;;  %357 = vrsqrt.f32 %v553_v29  ;;  %vm148_vm5 = vcmp.eq.f32.partialorder %v550_v26, 0.0  ;;  %v149_v16 = vand.u32 2147483648, %v550_v26 }
  0x95   :  { %v99_v33 = vmul.f32 %v352_v27, %v98_v30  ;;  %v204_v53 = vmul.f32 0.5, %v203_v39  ;;  %vm116_vm6 = vcmp.eq.f32.partialorder %v553_v29, inf  ;;  %vm118_vm7 = vcmp.eq.f32.partialorder %v553_v29, 0.0 }
  0x96   :  { %v130_v34 = vmul.f32 0.5, %v129_v31 }
  0x97   :  { %v100_v35 = vmul.f32 0.5, %v99_v33  ;;  %v205_v3 = vsub.f32 1.5, %v204_v53 }
  0x98   :  { %v354_v36 = vpop.eup %353  ;;  %v131_v37 = vsub.f32 1.5, %v130_v34 }
  0x99   :  { %v356_v38 = vpop.eup %355  ;;  %v101_v40 = vsub.f32 1.5, %v100_v35  ;;  %v214_v41 = vmul.f32 %v354_v36, %v548_v25  ;;  %v206_v15 = vmul.f32 %v546_v23, %v205_v3 }
  0x9a   :  { %v561_v42 = vpop.xlane.xlu1 %229  ;;  %v132_v43 = vmul.f32 %v350_v24, %v131_v37  ;;  %v140_v44 = vmul.f32 %v356_v38, %v550_v26  ;;  %v358_v46 = vpop.eup %357 }
  0x9b   :  { %359 = vrsqrt.f32 %v561_v42  ;;  %v565_v45 = vpop.xlane.xlu0 %227  ;;  %v102_v48 = vmul.f32 %v352_v27, %v101_v40  ;;  %v215_v49 = vmul.f32 %v354_v36, %v214_v41  ;;  %v110_v52 = vmul.f32 %v358_v46, %v553_v29 }
  0x9c   :  { %v133_v50 = vmul.f32 %v132_v43, %v124_v21  ;;  %v141_v51 = vmul.f32 %v356_v38, %v140_v44  ;;  %361 = vrsqrt.f32 %v565_v45  ;;  %v207_v31 = vmul.f32 %v206_v15, %v543_v20 }
  0x9d   :  { %v103_v54 = vmul.f32 %v102_v48, %v94_v22  ;;  %v216_v55 = vmul.f32 0.5, %v215_v49  ;;  %v111_v59 = vmul.f32 %v358_v46, %v110_v52  ;;  %vm250_vm10 = vcmp.eq.f32.partialorder %v561_v42, inf }
  0x9e   :  { %v135_v56 = vsel %vm134_vm0, %v124_v21, %v133_v50  ;;  %v142_v58 = vmul.f32 0.5, %v141_v51  ;;  %v119_v21 = vand.u32 2147483648, %v553_v29  ;;  %v209_v41 = vsel %vm208_vm9, %v543_v20, %v207_v31 }
  0x9f   :  { %v138_v60 = vsel %vm136_vm1, %v137_v47, %v135_v56  ;;  %v105_v61 = vsel %vm104_vm2, %v94_v22, %v103_v54  ;;  %v217_v62 = vsub.f32 1.5, %v216_v55  ;;  %v112_v2 = vmul.f32 0.5, %v111_v59 }
  0xa0   :  { %v108_v0 = vsel %vm106_vm3, %v107_v57, %v105_v61  ;;  %v143_v1 = vsub.f32 1.5, %v142_v58  ;;  %vm252_vm12 = vcmp.eq.f32.partialorder %v561_v42, 0.0  ;;  %v211_v48 = vand.u32 2147483648, %v543_v20  ;;  %v88_v61 = vpop.xlane.xlu2 %87 }
  0xa1   :  { %v360_v63 = vpop.eup %359  ;;  %v151_v5 = vmul.f32 %v138_v60, %v108_v0  ;;  %v113_v7 = vsub.f32 1.5, %v112_v2  ;;  %v218_v9 = vmul.f32 %v354_v36, %v217_v62  ;;  %v223_v36 = vand.u32 2147483648, %v548_v25 }
  0xa2   :  { %v244_v4 = vmul.f32 %v360_v63, %v561_v42  ;;  %v144_v6 = vmul.f32 %v356_v38, %v143_v1  ;;  %v362_v8 = vpop.eup %361  ;;  %vm238_vm13 = vcmp.eq.f32.partialorder %v565_v45, inf  ;;  %v241_v49 = vand.u32 2147483648, %v565_v45 }
  0xa3   :  { %v573_v11 = vadd.f32 1e-06, %v151_v5  ;;  %v114_v13 = vmul.f32 %v358_v46, %v113_v7  ;;  %v232_v14 = vmul.f32 %v362_v8, %v565_v45  ;;  %v219_v24 = vmul.f32 %v218_v9, %v548_v25 }
  0xa4   :  { %v245_v10 = vmul.f32 %v360_v63, %v244_v4  ;;  %v145_v12 = vmul.f32 %v144_v6, %v550_v26  ;;  %vm240_vm15 = vcmp.eq.f32.partialorder %v565_v45, 0.0  ;;  %v212_v51 = vsel %vm210_vm14, %v211_v48, %v209_v41 }
  0xa5   :  { %v115_v19 = vmul.f32 %v114_v13, %v553_v29  ;;  %v233_v22 = vmul.f32 %v362_v8, %v232_v14  ;;  %363 = vrcp.f32 %v573_v11  ;;  %v221_v35 = vsel %vm220_vm8, %v548_v25, %v219_v24  ;;  %v90_v24 = vpop.xlane.xlu0 %89 }
  0xa6   :  { %v246_v17 = vmul.f32 0.5, %v245_v10  ;;  %v147_v18 = vsel %vm146_vm4, %v550_v26, %v145_v12  ;;  %v224_v44 = vsel %vm222_vm11, %v223_v36, %v221_v35  ;;  %vm160_vm1 = vweird.f32 %v573_v11 }
  0xa7   :  { %v150_v27 = vsel %vm148_vm5, %v149_v16, %v147_v18  ;;  %v117_v23 = vsel %vm116_vm6, %v553_v29, %v115_v19  ;;  %v234_v30 = vmul.f32 0.5, %v233_v22  ;;  %v253_v29 = vand.u32 2147483648, %v561_v42 }
  0xa8   :  { %v247_v28 = vsub.f32 1.5, %v246_v17  ;;  %v120_v32 = vsel %vm118_vm7, %v119_v21, %v117_v23  ;;  %v164_v5 = vand.u32 2147483647, %v573_v11  ;;  %v166_v6 = vand.u32 2147483648, %v573_v11 }
  0xa9   :  { %v235_v33 = vsub.f32 1.5, %v234_v30  ;;  %v152_v34 = vmul.f32 %v150_v27, %v120_v32 }
  0xaa   :  { %v248_v26 = vmul.f32 %v360_v63, %v247_v28  ;;  %v194_v28 = vpop.xlane.xlu2 %193  ;;  %v167_v23 = vor.u32 1.1754944e-38, %v166_v6 }
  0xab   :  { %v236_v38 = vmul.f32 %v362_v8, %v235_v33  ;;  %v154_v39 = vadd.f32 1e-06, %v152_v34  ;;  %v596_v40 = vpop.eup %363  ;;  %v192_v34 = vpop.xlane.xlu1 %191 }
  0xac   :  { %v249_v37 = vmul.f32 %v248_v26, %v561_v42  ;;  %vm161_vm2 = vweird.f32 %v596_v40 }
  0xad   :  { %v237_v47 = vmul.f32 %v236_v38, %v565_v45  ;;  %365 = vrcp.f32 %v154_v39  ;;  %v179_v0 = vand.u32 2147483647, %v154_v39  ;;  %v181_v1 = vand.u32 2147483648, %v154_v39  ;;  %vm625_vm6 = vmor %vm160_vm1, %vm161_vm2 }
  0xae   :  { %v251_v43 = vsel %vm250_vm10, %v561_v42, %v249_v37  ;;  %v156_v42 = vmul.f32 %v596_v40, %v573_v11  ;;  %vm175_vm3 = vweird.f32 %v154_v39 }
  0xaf   :  { %v254_v46 = vsel %vm252_vm12, %v253_v29, %v251_v43  ;;  %v239_v25 = vsel %vm238_vm13, %v565_v45, %v237_v47  ;;  %vm180_vm7 = vcmp.eq.f32.partialorder %v179_v0, 8.507059e+37  ;;  %v182_v15 = vor.u32 1.1754944e-38, %v181_v1 }
  0xb0   :  { %v256_v50 = vmul.f32 %v254_v46, %v224_v44  ;;  %v242_v52 = vsel %vm240_vm15, %v241_v49, %v239_v25  ;;  %v157_v56 = vsub.f32 1.0, %v156_v42  ;;  %vm165_vm12 = vcmp.eq.f32.partialorder %v164_v5, 8.507059e+37 }
  0xb1   :  { %v255_v54 = vmul.f32 %v242_v52, %v212_v51 }
  0xb2   :  { %v258_v53 = vadd.f32 1e-06, %v256_v50  ;;  %v158_v20 = vmul.f32 %v596_v40, %v157_v56 }
  0xb3   :  { %v366_v55 = vpop.eup %365  ;;  %v257_v57 = vadd.f32 1e-06, %v255_v54 }
  0xb4   :  { %367 = vrcp.f32 %v258_v53  ;;  %v171_v58 = vmul.f32 %v366_v55, %v154_v39  ;;  %vm176_vm0 = vweird.f32 %v366_v55  ;;  %v159_v3 = vadd.f32 %v596_v40, %v158_v20 }
  0xb5   :  { %369 = vrcp.f32 %v257_v57  ;;  %vm617_vm4 = vmor %vm175_vm3, %vm176_vm0  ;;  %v285_v9 = vand.u32 2147483648, %v258_v53  ;;  %v283_v13 = vand.u32 2147483647, %v258_v53  ;;  %vm279_vm8 = vweird.f32 %v258_v53 }
  0xb6   :  { %v172_v59 = vsub.f32 1.0, %v171_v58  ;;  %v163_v17 = vsel %vm625_vm6, %v596_v40, %v159_v3  ;;  %v268_v18 = vand.u32 2147483647, %v257_v57  ;;  %v270_v19 = vand.u32 2147483648, %v257_v57 }
  0xb7   :  { %v286_v11 = vor.u32 1.1754944e-38, %v285_v9  ;;  %vm284_vm11 = vcmp.eq.f32.partialorder %v283_v13, 8.507059e+37  ;;  %vm264_vm13 = vweird.f32 %v257_v57  ;;  %v168_v26 = vsel %vm165_vm12, %v167_v23, %v163_v17 }
  0xb8   :  { %v173_v62 = vmul.f32 %v366_v55, %v172_v59  ;;  %v271_v35 = vor.u32 1.1754944e-38, %v270_v19  ;;  %vm269_vm15 = vcmp.eq.f32.partialorder %v268_v18, 8.507059e+37  ;;  %vm302_vm0 = vcmask 7168  }
  0xb9   :  { %v169_v39 = vmul.f32 %v168_v26, %v88_v61 }
  0xba   :  { %v368_v60 = vpop.eup %367  ;;  %v174_v63 = vadd.f32 %v366_v55, %v173_v62 }
  0xbb   :  { %v275_v45 = vmul.f32 %v368_v60, %v258_v53  ;;  %v370_v2 = vpop.eup %369  ;;  %vm280_vm5 = vweird.f32 %v368_v60 }
  0xbc   :  { %v260_v8 = vmul.f32 %v370_v2, %v257_v57  ;;  %v178_v10 = vsel %vm617_vm4, %v366_v55, %v174_v63  ;;  %vm265_vm9 = vweird.f32 %v370_v2  ;;  %vm281_vm10 = vmor %vm279_vm8, %vm280_vm5 }
  0xbd   :  { %v276_v4 = vsub.f32 1.0, %v275_v45  ;;  %v183_v22 = vsel %vm180_vm7, %v182_v15, %v178_v10  ;;  %vm266_vm14 = vmor %vm264_vm13, %vm265_vm9 }
  0xbe   :  { %v261_v16 = vsub.f32 1.0, %v260_v8  ;;  %v184_v33 = vmul.f32 %v183_v22, %v90_v24 }
  0xbf   :  { %v277_v12 = vmul.f32 %v368_v60, %v276_v4 }
  0xc0   :  { %v262_v27 = vmul.f32 %v370_v2, %v261_v16 }
  0xc1   :  { %v278_v21 = vadd.f32 %v368_v60, %v277_v12 }
  0xc2   :  { %v263_v31 = vadd.f32 %v370_v2, %v262_v27 }
  0xc3   :  { %v282_v30 = vsel %vm281_vm10, %v368_v60, %v278_v21 }
  0xc4   :  { %v287_v32 = vsel %vm284_vm11, %v286_v11, %v282_v30  ;;  %v267_v37 = vsel %vm266_vm14, %v370_v2, %v263_v31 }
  0xc5   :  { %v288_v36 = vmul.f32 %v287_v32, %v194_v28  ;;  %v272_v29 = vsel %vm269_vm15, %v271_v35, %v267_v37 }
  0xc6   :  { %v273_v40 = vmul.f32 %v272_v29, %v192_v34 }
  0xc7   :  { %v290_v38 = vadd.f32 %v288_v36, %v184_v33 }
  0xc8   :  { %v289_v41 = vadd.f32 %v273_v40, %v169_v39 }
  0xc9   :  { %v304_v43 = vsel %vm302_vm0, %v290_v38, 0.0 }
  0xca   :  { %v303_v44 = vsel %vm302_vm0, %v289_v41, 0.0 }
  0xcb   :  { %v305_v46 = vadd.f32 %v304_v43, %v303_v44 }
  0xcd   :  { %306 = vadd.xlane.f32.xlu0 %v305_v46 }
 0x140   :  { %v307_v47 = vpop.xlane.xlu0 %306 }
 0x141   :  { %v308_v48 = vrot.slane %v307_v47, 4 }
 0x143   :  { %v309_v49 = vadd.f32 %v308_v48, %v307_v47 }
 0x145   :  { %v310_v50 = vrot.slane %v309_v49, 2 }
 0x147   :  { %v311_v25 = vadd.f32 %v310_v50, %v309_v49 }
 0x149   :  { %v312_v42 = vrot.slane %v311_v25, 1 }
 0x14b   :  { %v313_v51 = vadd.f32 %v312_v42, %v311_v25 }
 0x14d   :  { %338 = vpush %v313_v51 }
 0x17e   :  { %s339_s12 = spop %338 }
 0x17f   :  { %s315_s13 = smul.f32 -0.5, %s339_s12 }
 0x181   :  { %v316_v52 = vstv %s315_s13 }
 0x182   :  { %318 = vst [vmem:[#allocation10] sm:$0xff] %v316_v52 }
 0x183   :  { %329 = dma.vmem_to_hbm [thread:$0]  %s325_s3, 128, %s327_s11, [#allocation4]  }
 0x184   :  { %497 = dma.done.wait [#allocation4], 128  }
 0x185   :  { %498 = vsyncadd [#allocation4], 4294967168 }
 0x186   :  { %334 = vsyncpa [#allocation3], 1 }
 0x187   :  { %335 = vsyncpa [#allocation6], 1 }
 0x188   :  { %336 = vsyncpa [#allocation9], 1 }
 0x189   :  { %337 = vsyncpa [#allocation4], 1 }

</bundles_post_ra>
